<compile_context>
chip_gen: v6e
topology: v6e:2x2x1
jax: 0.10.0
libtpu: 0.0.40
codegen_flags: <defaults>
</compile_context>

<pallas_src>
import math

import jax
import jax.numpy as jnp
from jax.experimental import pallas as pl
from jax.experimental.pallas import tpu as pltpu

_INV_SQRT2 = 1.0 / math.sqrt(2.0)
_SQRT_2_OVER_PI = math.sqrt(2.0 / math.pi)


# ----------------------------------------------------------------------------
# Fused multi-scale kernel: one grid step = one (batch, channel-tile) slab
# pushed through every down-sampling layer; outputs stored pre-permuted.
# ----------------------------------------------------------------------------
def _make_fused_kernel(num_layers, compute_dtype, approximate_gelu):
    n_season = num_layers + 1

    def kernel(*refs):
        season_refs = refs[:n_season]
        w_refs = refs[n_season:n_season + 4 * num_layers]
        out_refs = refs[n_season + 4 * num_layers:]

        # ---- scale 0: the module's out_high.permute(0, 2, 1) passthrough,
        # emitted in-kernel so XLA never re-reads season_list[0] from HBM. ----
        high_in = season_refs[0][0]                               # (TILE_C, L0)
        out_refs[0][0] = jnp.transpose(high_in.astype(jnp.float32)).astype(
            out_refs[0].dtype)

        high = high_in.astype(jnp.float32)                        # (TILE_C, L0)
        low = season_refs[1][0].astype(jnp.float32)               # (TILE_C, L1)

        for i in range(num_layers):
            w1 = w_refs[4 * i + 0][...]                           # (L_in, L_out)
            b1 = w_refs[4 * i + 1][...].astype(jnp.float32)       # (1, L_out)
            w2 = w_refs[4 * i + 2][...]                           # (L_out, L_out)
            b2 = w_refs[4 * i + 3][...].astype(jnp.float32)       # (1, L_out)

            # Linear1 on the MXU (bf16 operands by default, f32 accumulate).
            h = jnp.dot(high.astype(compute_dtype), w1,
                        preferred_element_type=jnp.float32) + b1
            if approximate_gelu:
                # tanh-GELU: transcendental goes to the EUP slot (co-issues).
                h = 0.5 * h * (1.0 + jnp.tanh(
                    _SQRT_2_OVER_PI * (h + 0.044715 * h * h * h)))
            else:
                # exact erf-GELU, matching torch.nn.GELU() default semantics.
                h = 0.5 * h * (1.0 + jax.lax.erf(h * _INV_SQRT2))
            # Linear2 + bias + residual, all in f32 (residual path stays exact).
            y = jnp.dot(h.astype(compute_dtype), w2,
                        preferred_element_type=jnp.float32) + b2
            res = low + y                                         # (TILE_C, L_out)

            # store already permuted: (L_out, TILE_C) tile of the (B, L, C) out
            out_refs[i + 1][0] = jnp.transpose(res).astype(out_refs[i + 1].dtype)

            high = res                        # feeds the next (smaller) scale
            if i + 2 < n_season:
                low = season_refs[i + 2][0].astype(jnp.float32)

    return kernel


def _vmem_capacity_bytes():
    try:
        info = pltpu.get_tpu_info()
        cap = getattr(info, "vmem_capacity_bytes", None)
        if cap:
            return int(cap)
    except Exception:
        pass
    return 64 * 1024 * 1024          # conservative fallback: v7x physical VMEM


def _round_up(x, m):
    return -(-x // m) * m


# ----------------------------------------------------------------------------
# Module-level forward.  season_list[i]: (B, C, L_i); params[i] = (W1,b1,W2,b2)
# with W stored as (in, out) (transposed vs torch.nn.Linear.weight).
# Returns [season_list[0].permute(0,2,1)] + [(B, L_{i+1}, C) layer outputs].
# ----------------------------------------------------------------------------
def multi_scale_season_cross(season_list, params, *,
                             compute_dtype=jnp.bfloat16,
                             approximate_gelu=False,
                             tile_c=None):
    n_season = len(season_list)
    num_layers = n_season - 1
    assert num_layers >= 1 and len(params) == num_layers
    B, C, _ = season_list[0].shape
    lens = [int(s.shape[2]) for s in season_list]
    out_dtype = season_list[0].dtype
    act_item = jnp.dtype(out_dtype).itemsize

    if compute_dtype is None:
        compute_dtype = jnp.float32

    # Only matmul weights are cast to the compute dtype (halves weight HBM
    # traffic, bf16 MXU path); biases / residuals / outputs stay f32-precision.
    params_c = [(w1.astype(compute_dtype), b1, w2.astype(compute_dtype), b2)
                for (w1, b1, w2, b2) in params]
    weight_bytes = sum(int(p.size) * jnp.dtype(p.dtype).itemsize
                       for layer in params_c for p in layer)

    # ---- generation-aware VMEM budget (128 MiB on v5e/v6e, 64 MiB on v7x) ---
    vmem_cap = _vmem_capacity_bytes()
    budget = int(vmem_cap * 0.70)

    # per-channel-row VMEM: double-buffered in/out blocks + f32 temporaries
    per_c = (2 * sum(lens) * act_item          # season input blocks
             + 2 * sum(lens) * act_item        # output blocks (incl. passthrough)
             + 8 * lens[0] * 4)                # f32 intermediates (conservative)
    fixed = 2 * weight_bytes + (2 << 20)       # 2x weights + Mosaic scratch slack

    if tile_c is None:
        if C <= 128 or fixed + C * per_c <= budget:
            tile_c = C
        else:
            tile_c = 128
            for cand in (1024, 512, 256, 128):
                if cand < C and fixed + cand * per_c <= budget:
                    tile_c = cand
                    break
        # guarantee >= 2 grid steps (v7x megacore / DMA pipelining) if possible
        if B * (_round_up(C, tile_c) // tile_c) < 2 and C >= 256:
            tile_c = max(128, (C // 2) // 128 * 128)

    if tile_c >= C:
        c_pad = _round_up(C, 8)                      # sublane-friendly slabs
        tile_c = c_pad
    else:
        tile_c = max(128, (tile_c // 128) * 128)     # lane-legal when tiling C
        c_pad = _round_up(C, tile_c)

    seasons = season_list
    if c_pad != C:
        seasons = [jnp.pad(s, ((0, 0), (0, c_pad - C), (0, 0)))
                   for s in season_list]

    need = fixed + tile_c * per_c
    vmem_limit = int(min(max(need + (4 << 20), 32 << 20), int(vmem_cap * 0.78)))

    # ---- BlockSpecs: grid over (batch, channel-tiles); weights stay resident
    in_specs = [pl.BlockSpec((1, tile_c, lens[i]), lambda b, c: (b, c, 0))
                for i in range(n_season)]
    flat_params = []
    for (w1, b1, w2, b2) in params_c:
        in_specs += [pl.BlockSpec(w1.shape, lambda b, c: (0, 0)),
                     pl.BlockSpec(b1.shape, lambda b, c: (0, 0)),
                     pl.BlockSpec(w2.shape, lambda b, c: (0, 0)),
                     pl.BlockSpec(b2.shape, lambda b, c: (0, 0))]
        flat_params += [w1, b1, w2, b2]
    out_specs = tuple(pl.BlockSpec((1, lens[i], tile_c), lambda b, c: (b, 0, c))
                      for i in range(n_season))
    out_shape = tuple(jax.ShapeDtypeStruct((B, lens[i], c_pad), out_dtype)
                      for i in range(n_season))

    # advisory cost estimate so XLA schedules the neighbours sensibly
    R = B * C
    flops = sum(2 * R * (lens[i] * lens[i + 1] + lens[i + 1] * lens[i + 1])
                for i in range(num_layers))
    cost = pl.CostEstimate(flops=int(flops),
                           transcendentals=int(R * sum(lens[1:])),
                           bytes_accessed=int(2 * act_item * R * sum(lens)
                                              + weight_bytes))

    results = pl.pallas_call(
        _make_fused_kernel(num_layers, compute_dtype, approximate_gelu),
        out_shape=out_shape,
        grid=(B, c_pad // tile_c),
        in_specs=in_specs,
        out_specs=out_specs,
        compiler_params=pltpu.CompilerParams(
            dimension_semantics=("parallel", "parallel"),
            vmem_limit_bytes=vmem_limit),
        cost_estimate=cost,
    )(*seasons, *flat_params)

    if c_pad != C:
        results = tuple(r[:, :, :C] for r in results)
    return list(results)


# ----------------------------------------------------------------------------
# Deterministic parameter construction (shapes per the module's __init__)
# ----------------------------------------------------------------------------
def init_params(key, seq_len, window, num_layers, dtype=jnp.float32):
    params = []
    for i in range(num_layers):
        lin = seq_len // window ** i
        lout = seq_len // window ** (i + 1)
        key, k1, k2, k3, k4 = jax.random.split(key, 5)
        s1 = 1.0 / math.sqrt(lin)
        s2 = 1.0 / math.sqrt(lout)
        w1 = jax.random.uniform(k1, (lin, lout), dtype, -s1, s1)   # (in, out)
        b1 = jax.random.uniform(k2, (1, lout), dtype, -s1, s1)
        w2 = jax.random.uniform(k3, (lout, lout), dtype, -s2, s2)
        b2 = jax.random.uniform(k4, (1, lout), dtype, -s2, s2)
        params.append((w1, b1, w2, b2))
    return params


# ----------------------------------------------------------------------------
# Pure-JAX (f32) reference for the correctness check
# ----------------------------------------------------------------------------
def reference_forward(season_list, params):
    out_high = season_list[0]
    out_low = season_list[1]
    outs = [jnp.transpose(out_high, (0, 2, 1))]
    n = len(season_list)
    for i in range(n - 1):
        w1, b1, w2, b2 = params[i]
        h = jax.nn.gelu(out_high @ w1 + b1, approximate=False)
        res = h @ w2 + b2
        out_low = out_low + res
        out_high = out_low
        if i + 2 <= n - 1:
            out_low = season_list[i + 2]
        outs.append(jnp.transpose(out_high, (0, 2, 1)))
    return outs


def _run_case(key, B, C, seq_len, window, num_layers, compute_dtype, tol):
    key, pkey, *skeys = jax.random.split(key, num_layers + 3)
    season_list = [
        jax.random.normal(skeys[i], (B, C, seq_len // window ** i), jnp.float32)
        for i in range(num_layers + 1)
    ]
    params = init_params(pkey, seq_len, window, num_layers)

    outs = multi_scale_season_cross(season_list, params,
                                    compute_dtype=compute_dtype)
    outs = [jax.block_until_ready(o) for o in outs]

    refs = reference_forward(season_list, params)
    for o, r in zip(outs, refs):
        assert o.shape == r.shape, (o.shape, r.shape)
        err = float(jnp.max(jnp.abs(o - r)))
        assert jnp.allclose(o, r, atol=tol, rtol=tol), err
    return key


if __name__ == "__main__":
    key = jax.random.PRNGKey(0)
    # f32 compute path: bit-tight check vs the pure-JAX reference
    key = _run_case(key, B=2, C=4, seq_len=16, window=2, num_layers=2,
                    compute_dtype=jnp.float32, tol=1e-5)
    # default bf16 matmul path (f32 residual/bias/GELU), non-multiple-of-8 C
    key = _run_case(key, B=3, C=5, seq_len=64, window=2, num_layers=3,
                    compute_dtype=jnp.bfloat16, tol=5e-2)
    # lane-dense channel count (C=128), default bf16 path
    key = _run_case(key, B=2, C=128, seq_len=64, window=2, num_layers=2,
                    compute_dtype=jnp.bfloat16, tol=5e-2)
    print("KERNEL_OK")
</pallas_src>

<mosaic_0001>
module attributes {stable_mosaic.version = 11 : i64} {
  func.func @kernel(%arg0: i32, %arg1: i32, %arg2: memref<1x8x16xf32, #tpu.memory_space<vmem>>, %arg3: memref<1x8x8xf32, #tpu.memory_space<vmem>>, %arg4: memref<1x8x4xf32, #tpu.memory_space<vmem>>, %arg5: memref<16x8xf32, #tpu.memory_space<vmem>>, %arg6: memref<1x8xf32, #tpu.memory_space<vmem>>, %arg7: memref<8x8xf32, #tpu.memory_space<vmem>>, %arg8: memref<1x8xf32, #tpu.memory_space<vmem>>, %arg9: memref<8x4xf32, #tpu.memory_space<vmem>>, %arg10: memref<1x4xf32, #tpu.memory_space<vmem>>, %arg11: memref<4x4xf32, #tpu.memory_space<vmem>>, %arg12: memref<1x4xf32, #tpu.memory_space<vmem>>, %arg13: memref<1x16x8xf32, #tpu.memory_space<vmem>>, %arg14: memref<1x8x8xf32, #tpu.memory_space<vmem>>, %arg15: memref<1x4x8xf32, #tpu.memory_space<vmem>>) attributes {dimension_semantics = [#tpu.dimension_semantics<parallel>, #tpu.dimension_semantics<parallel>], iteration_bounds = array<i64: 2, 1>, scalar_prefetch = 0 : i64, scratch_operands = 0 : i64, tpu.core_type = #tpu.core_type<tc>, window_params = [{transform_indices = @transform_0, window_bounds = array<i64: 1, 8, 16>}, {transform_indices = @transform_1, window_bounds = array<i64: 1, 8, 8>}, {transform_indices = @transform_2, window_bounds = array<i64: 1, 8, 4>}, {pipeline_mode = #tpu.pipeline_mode<synchronous>, transform_indices = @transform_3, window_bounds = array<i64: 16, 8>}, {pipeline_mode = #tpu.pipeline_mode<synchronous>, transform_indices = @transform_4, window_bounds = array<i64: 1, 8>}, {pipeline_mode = #tpu.pipeline_mode<synchronous>, transform_indices = @transform_5, window_bounds = array<i64: 8, 8>}, {pipeline_mode = #tpu.pipeline_mode<synchronous>, transform_indices = @transform_6, window_bounds = array<i64: 1, 8>}, {pipeline_mode = #tpu.pipeline_mode<synchronous>, transform_indices = @transform_7, window_bounds = array<i64: 8, 4>}, {pipeline_mode = #tpu.pipeline_mode<synchronous>, transform_indices = @transform_8, window_bounds = array<i64: 1, 4>}, {pipeline_mode = #tpu.pipeline_mode<synchronous>, transform_indices = @transform_9, window_bounds = array<i64: 4, 4>}, {pipeline_mode = #tpu.pipeline_mode<synchronous>, transform_indices = @transform_10, window_bounds = array<i64: 1, 4>}, {transform_indices = @transform_11, window_bounds = array<i64: 1, 16, 8>}, {transform_indices = @transform_12, window_bounds = array<i64: 1, 8, 8>}, {transform_indices = @transform_13, window_bounds = array<i64: 1, 4, 8>}]} {
    %c0 = arith.constant 0 : index
    %c0_0 = arith.constant 0 : index
    %c0_1 = arith.constant 0 : index
    %0 = vector.load %arg2[%c0, %c0_0, %c0_1] : memref<1x8x16xf32, #tpu.memory_space<vmem>>, vector<1x8x16xf32>
    %1 = vector.shape_cast %0 : vector<1x8x16xf32> to vector<8x16xf32>
    %2 = tpu.transpose %1, [1, 0] : vector<8x16xf32> -> vector<16x8xf32>
    %c0_2 = arith.constant 0 : index
    %c0_3 = arith.constant 0 : index
    %c0_4 = arith.constant 0 : index
    %3 = vector.load %arg13[%c0_2, %c0_3, %c0_4] : memref<1x16x8xf32, #tpu.memory_space<vmem>>, vector<1x16x8xf32>
    %4 = vector.shape_cast %3 : vector<1x16x8xf32> to vector<16x8xf32>
    %5 = vector.shape_cast %2 : vector<16x8xf32> to vector<1x16x8xf32>
    tpu.vector_store %arg13[%c0_2, %c0_3, %c0_4], %5 {strides = array<i32>} : memref<1x16x8xf32, #tpu.memory_space<vmem>>, vector<1x16x8xf32>,
    %c0_5 = arith.constant 0 : index
    %c0_6 = arith.constant 0 : index
    %c0_7 = arith.constant 0 : index
    %6 = vector.load %arg3[%c0_5, %c0_6, %c0_7] : memref<1x8x8xf32, #tpu.memory_space<vmem>>, vector<1x8x8xf32>
    %7 = vector.shape_cast %6 : vector<1x8x8xf32> to vector<8x8xf32>
    %c0_8 = arith.constant 0 : index
    %c0_9 = arith.constant 0 : index
    %8 = vector.load %arg5[%c0_8, %c0_9] : memref<16x8xf32, #tpu.memory_space<vmem>>, vector<16x8xf32>
    %c0_10 = arith.constant 0 : index
    %c0_11 = arith.constant 0 : index
    %9 = vector.load %arg6[%c0_10, %c0_11] : memref<1x8xf32, #tpu.memory_space<vmem>>, vector<1x8xf32>
    %c0_12 = arith.constant 0 : index
    %c0_13 = arith.constant 0 : index
    %10 = vector.load %arg7[%c0_12, %c0_13] : memref<8x8xf32, #tpu.memory_space<vmem>>, vector<8x8xf32>
    %c0_14 = arith.constant 0 : index
    %c0_15 = arith.constant 0 : index
    %11 = vector.load %arg8[%c0_14, %c0_15] : memref<1x8xf32, #tpu.memory_space<vmem>>, vector<1x8xf32>
    %cst = arith.constant dense<0.000000e+00> : vector<8x8xf32>
    %12 = tpu.matmul %1, %8, %cst {dimension_numbers = #tpu.dot_dimension_numbers<[1], [0], [0], [1], [0, 0, 1, 1], [], []>} : vector<8x16xf32>, vector<16x8xf32>, vector<8x8xf32> -> vector<8x8xf32>
    %13 = vector.broadcast %9 : vector<1x8xf32> to vector<8x8xf32>
    %14 = arith.addf %12, %13 : vector<8x8xf32>
    %cst_16 = arith.constant 5.000000e-01 : f32
    %15 = vector.broadcast %cst_16 : f32 to vector<8x8xf32>
    %16 = arith.mulf %15, %14 : vector<8x8xf32>
    %cst_17 = arith.constant 0.707106769 : f32
    %17 = vector.broadcast %cst_17 : f32 to vector<8x8xf32>
    %18 = arith.mulf %14, %17 : vector<8x8xf32>
    %19 = math.erf %18 : vector<8x8xf32>
    %cst_18 = arith.constant 1.000000e+00 : f32
    %20 = vector.broadcast %cst_18 : f32 to vector<8x8xf32>
    %21 = arith.addf %20, %19 : vector<8x8xf32>
    %22 = arith.mulf %16, %21 : vector<8x8xf32>
    %cst_19 = arith.constant dense<0.000000e+00> : vector<8x8xf32>
    %23 = tpu.matmul %22, %10, %cst_19 {dimension_numbers = #tpu.dot_dimension_numbers<[1], [0], [0], [1], [0, 0, 1, 1], [], []>} : vector<8x8xf32>, vector<8x8xf32>, vector<8x8xf32> -> vector<8x8xf32>
    %24 = vector.broadcast %11 : vector<1x8xf32> to vector<8x8xf32>
    %25 = arith.addf %23, %24 : vector<8x8xf32>
    %26 = arith.addf %7, %25 : vector<8x8xf32>
    %27 = tpu.transpose %26, [1, 0] : vector<8x8xf32> -> vector<8x8xf32>
    %c0_20 = arith.constant 0 : index
    %c0_21 = arith.constant 0 : index
    %c0_22 = arith.constant 0 : index
    %28 = vector.load %arg14[%c0_20, %c0_21, %c0_22] : memref<1x8x8xf32, #tpu.memory_space<vmem>>, vector<1x8x8xf32>
    %29 = vector.shape_cast %28 : vector<1x8x8xf32> to vector<8x8xf32>
    %30 = vector.shape_cast %27 : vector<8x8xf32> to vector<1x8x8xf32>
    tpu.vector_store %arg14[%c0_20, %c0_21, %c0_22], %30 {strides = array<i32>} : memref<1x8x8xf32, #tpu.memory_space<vmem>>, vector<1x8x8xf32>,
    %c0_23 = arith.constant 0 : index
    %c0_24 = arith.constant 0 : index
    %c0_25 = arith.constant 0 : index
    %31 = vector.load %arg4[%c0_23, %c0_24, %c0_25] : memref<1x8x4xf32, #tpu.memory_space<vmem>>, vector<1x8x4xf32>
    %32 = vector.shape_cast %31 : vector<1x8x4xf32> to vector<8x4xf32>
    %c0_26 = arith.constant 0 : index
    %c0_27 = arith.constant 0 : index
    %33 = vector.load %arg9[%c0_26, %c0_27] : memref<8x4xf32, #tpu.memory_space<vmem>>, vector<8x4xf32>
    %c0_28 = arith.constant 0 : index
    %c0_29 = arith.constant 0 : index
    %34 = vector.load %arg10[%c0_28, %c0_29] : memref<1x4xf32, #tpu.memory_space<vmem>>, vector<1x4xf32>
    %c0_30 = arith.constant 0 : index
    %c0_31 = arith.constant 0 : index
    %35 = vector.load %arg11[%c0_30, %c0_31] : memref<4x4xf32, #tpu.memory_space<vmem>>, vector<4x4xf32>
    %c0_32 = arith.constant 0 : index
    %c0_33 = arith.constant 0 : index
    %36 = vector.load %arg12[%c0_32, %c0_33] : memref<1x4xf32, #tpu.memory_space<vmem>>, vector<1x4xf32>
    %cst_34 = arith.constant dense<0.000000e+00> : vector<8x4xf32>
    %37 = tpu.matmul %26, %33, %cst_34 {dimension_numbers = #tpu.dot_dimension_numbers<[1], [0], [0], [1], [0, 0, 1, 1], [], []>} : vector<8x8xf32>, vector<8x4xf32>, vector<8x4xf32> -> vector<8x4xf32>
    %38 = vector.broadcast %34 : vector<1x4xf32> to vector<8x4xf32>
    %39 = arith.addf %37, %38 : vector<8x4xf32>
    %cst_35 = arith.constant 5.000000e-01 : f32
    %40 = vector.broadcast %cst_35 : f32 to vector<8x4xf32>
    %41 = arith.mulf %40, %39 : vector<8x4xf32>
    %cst_36 = arith.constant 0.707106769 : f32
    %42 = vector.broadcast %cst_36 : f32 to vector<8x4xf32>
    %43 = arith.mulf %39, %42 : vector<8x4xf32>
    %44 = math.erf %43 : vector<8x4xf32>
    %cst_37 = arith.constant 1.000000e+00 : f32
    %45 = vector.broadcast %cst_37 : f32 to vector<8x4xf32>
    %46 = arith.addf %45, %44 : vector<8x4xf32>
    %47 = arith.mulf %41, %46 : vector<8x4xf32>
    %cst_38 = arith.constant dense<0.000000e+00> : vector<8x4xf32>
    %48 = tpu.matmul %47, %35, %cst_38 {dimension_numbers = #tpu.dot_dimension_numbers<[1], [0], [0], [1], [0, 0, 1, 1], [], []>} : vector<8x4xf32>, vector<4x4xf32>, vector<8x4xf32> -> vector<8x4xf32>
    %49 = vector.broadcast %36 : vector<1x4xf32> to vector<8x4xf32>
    %50 = arith.addf %48, %49 : vector<8x4xf32>
    %51 = arith.addf %32, %50 : vector<8x4xf32>
    %52 = tpu.transpose %51, [1, 0] : vector<8x4xf32> -> vector<4x8xf32>
    %c0_39 = arith.constant 0 : index
    %c0_40 = arith.constant 0 : index
    %c0_41 = arith.constant 0 : index
    %53 = vector.load %arg15[%c0_39, %c0_40, %c0_41] : memref<1x4x8xf32, #tpu.memory_space<vmem>>, vector<1x4x8xf32>
    %54 = vector.shape_cast %53 : vector<1x4x8xf32> to vector<4x8xf32>
    %55 = vector.shape_cast %52 : vector<4x8xf32> to vector<1x4x8xf32>
    tpu.vector_store %arg15[%c0_39, %c0_40, %c0_41], %55 {strides = array<i32>} : memref<1x4x8xf32, #tpu.memory_space<vmem>>, vector<1x4x8xf32>,
    return
  }
  func.func @transform_0(%arg0: i32, %arg1: i32) -> (i32, i32, i32) {
    %c0_i32 = arith.constant 0 : i32
    %c0_i32_0 = arith.constant 0 : i32
    return %arg0, %arg1, %c0_i32 : i32, i32, i32
  }
  func.func @transform_1(%arg0: i32, %arg1: i32) -> (i32, i32, i32) {
    %c0_i32 = arith.constant 0 : i32
    %c0_i32_0 = arith.constant 0 : i32
    return %arg0, %arg1, %c0_i32 : i32, i32, i32
  }
  func.func @transform_2(%arg0: i32, %arg1: i32) -> (i32, i32, i32) {
    %c0_i32 = arith.constant 0 : i32
    %c0_i32_0 = arith.constant 0 : i32
    return %arg0, %arg1, %c0_i32 : i32, i32, i32
  }
  func.func @transform_3(%arg0: i32, %arg1: i32) -> (i32, i32) {
    %c0_i32 = arith.constant 0 : i32
    %c0_i32_0 = arith.constant 0 : i32
    %c0_i32_1 = arith.constant 0 : i32
    return %c0_i32, %c0_i32_0 : i32, i32
  }
  func.func @transform_4(%arg0: i32, %arg1: i32) -> (i32, i32) {
    %c0_i32 = arith.constant 0 : i32
    %c0_i32_0 = arith.constant 0 : i32
    %c0_i32_1 = arith.constant 0 : i32
    return %c0_i32, %c0_i32_0 : i32, i32
  }
  func.func @transform_5(%arg0: i32, %arg1: i32) -> (i32, i32) {
    %c0_i32 = arith.constant 0 : i32
    %c0_i32_0 = arith.constant 0 : i32
    %c0_i32_1 = arith.constant 0 : i32
    return %c0_i32, %c0_i32_0 : i32, i32
  }
  func.func @transform_6(%arg0: i32, %arg1: i32) -> (i32, i32) {
    %c0_i32 = arith.constant 0 : i32
    %c0_i32_0 = arith.constant 0 : i32
    %c0_i32_1 = arith.constant 0 : i32
    return %c0_i32, %c0_i32_0 : i32, i32
  }
  func.func @transform_7(%arg0: i32, %arg1: i32) -> (i32, i32) {
    %c0_i32 = arith.constant 0 : i32
    %c0_i32_0 = arith.constant 0 : i32
    %c0_i32_1 = arith.constant 0 : i32
    return %c0_i32, %c0_i32_0 : i32, i32
  }
  func.func @transform_8(%arg0: i32, %arg1: i32) -> (i32, i32) {
    %c0_i32 = arith.constant 0 : i32
    %c0_i32_0 = arith.constant 0 : i32
    %c0_i32_1 = arith.constant 0 : i32
    return %c0_i32, %c0_i32_0 : i32, i32
  }
  func.func @transform_9(%arg0: i32, %arg1: i32) -> (i32, i32) {
    %c0_i32 = arith.constant 0 : i32
    %c0_i32_0 = arith.constant 0 : i32
    %c0_i32_1 = arith.constant 0 : i32
    return %c0_i32, %c0_i32_0 : i32, i32
  }
  func.func @transform_10(%arg0: i32, %arg1: i32) -> (i32, i32) {
    %c0_i32 = arith.constant 0 : i32
    %c0_i32_0 = arith.constant 0 : i32
    %c0_i32_1 = arith.constant 0 : i32
    return %c0_i32, %c0_i32_0 : i32, i32
  }
  func.func @transform_11(%arg0: i32, %arg1: i32) -> (i32, i32, i32) {
    %c0_i32 = arith.constant 0 : i32
    %c0_i32_0 = arith.constant 0 : i32
    return %arg0, %c0_i32, %arg1 : i32, i32, i32
  }
  func.func @transform_12(%arg0: i32, %arg1: i32) -> (i32, i32, i32) {
    %c0_i32 = arith.constant 0 : i32
    %c0_i32_0 = arith.constant 0 : i32
    return %arg0, %c0_i32, %arg1 : i32, i32, i32
  }
  func.func @transform_13(%arg0: i32, %arg1: i32) -> (i32, i32, i32) {
    %c0_i32 = arith.constant 0 : i32
    %c0_i32_0 = arith.constant 0 : i32
    return %arg0, %c0_i32, %arg1 : i32, i32, i32
  }
}

</mosaic_0001>

<bundles_post_ra>
// kernel: tpu_custom_call.1
= control target key start
LH: loop header
LB: loop body
LE: loop exit
PB: predicated region body
PF: predicated region fallthrough
CT: control target
= control target key end

     0   :  { %s1701_s0 = inlined_call_operand.vmem [shape: f32[2,8,16], index: 0, kind: input, shape index: {}]   ;;  %s1702_s1 = inlined_call_operand.vmem [shape: f32[2,8,8], index: 1, kind: input, shape index: {}]   ;;  %s1703_s2 = inlined_call_operand.vmem [shape: f32[2,8,4], index: 2, kind: input, shape index: {}]   ;;  %s1704_s3 = inlined_call_operand.vmem [shape: f32[16,8], index: 3, kind: input, shape index: {}]   ;;  %s1705_s4 = inlined_call_operand.vmem [shape: f32[1,8], index: 4, kind: input, shape index: {}]   ;;  %s1706_s5 = inlined_call_operand.vmem [shape: f32[8,8], index: 5, kind: input, shape index: {}]   ;;  %s1707_s6 = inlined_call_operand.vmem [shape: f32[1,8], index: 6, kind: input, shape index: {}]   ;;  %s1708_s7 = inlined_call_operand.vmem [shape: f32[8,4], index: 7, kind: input, shape index: {}]   ;;  %s1709_s8 = inlined_call_operand.vmem [shape: f32[1,4], index: 8, kind: input, shape index: {}]   ;;  %s1710_s9 = inlined_call_operand.vmem [shape: f32[4,4], index: 9, kind: input, shape index: {}]   ;;  %s1711_s10 = inlined_call_operand.vmem [shape: f32[1,4], index: 10, kind: input, shape index: {}]   ;;  %s1712_s11 = inlined_call_operand.vmem [shape: f32[2,16,8], index: 11, kind: output, shape index: {0}]   ;;  %s1713_s12 = inlined_call_operand.hbm [shape: f32[2,8,8], index: 12, kind: output, shape index: {1}]   ;;  %s1714_s13 = inlined_call_operand.hbm [shape: f32[2,4,8], index: 13, kind: output, shape index: {2}]  }
   0x1   :  { %1716 = sst [smem:[#allocation9_spill]] %s1701_s0 }
   0x2   :  { %1717 = sst [smem:[#allocation10_spill]] %s1702_s1 }
   0x3   :  { %1718 = sst [smem:[#allocation11_spill]] %s1704_s3 }
   0x4   :  { %1719 = sst [smem:[#allocation12_spill]] %s1705_s4 }
   0x5   :  { %1720 = sst [smem:[#allocation13_spill]] %s1706_s5 }
   0x6   :  { %1721 = sst [smem:[#allocation14_spill]] %s1707_s6 }
   0x7   :  { %1722 = sst [smem:[#allocation15_spill]] %s1708_s7 }
   0x8   :  { %19 = vsyncpa [#allocation3], 0 }
   0x9   :  { %21 = vsyncpa [#allocation3 + $0x1], 0 }
   0xa   :  { %22 = vsyncpa [#allocation5], 0 }
   0xb   :  { %24 = vsyncpa [#allocation5 + $0x1], 0  ;;  %s1520_s25 = smov 0   ;;  %s1522_s26 = smov 0  }
   0xc   :  { %s1524_s27 = smov 0   ;;  %s1526_s28 = smov 0  }
   0xd   :  { %s1528_s29 = smov 0   ;;  %s1530_s30 = smov 0  }
   0xe LB: > { %s1213_s14 = sadd.s32 4294967295, %s1444_s30   ;;  %s1214_s15 = sadd.s32 4294967294, %s1444_s30   ;;  %s1444_s30 = sphi %s1530_s30, %s30_s30   ;;  %s1440_s29 = sphi %s1528_s29, %s1738_s29   ;;  %s1436_s28 = sphi %s1526_s28, %s1737_s28   ;;  %s1432_s27 = sphi %s1524_s27, %s1736_s27   ;;  %s1428_s26 = sphi %s1522_s26, %s1735_s26   ;;  %s1424_s25 = sphi %s1520_s25, %s1734_s25  }
   0xf   : > { %s42_s16 = sadd.s32 1, %s1440_s29  ;;  %s331_s17 = sadd.s32 1, %s1432_s27 }
  0x10   : > { %p44_p0 = scmp.ge.s32.totalorder %s42_s16, 2  ;;  %p341_p1 = scmp.ne.s32.totalorder %s1432_s27, %s1428_s26 }
  0x11   : > { %p342_p2 = scmp.eq.s32.totalorder %s1213_s14, 1  ;;  %p347_p3 = scmp.ne.s32.totalorder %s1428_s26, %s1424_s25 }
  0x12   : > { %s1740_s16 = smov (%p44_p0, %s42_s16), 0  ;;  %p348_p5 = scmp.eq.s32.totalorder %s1214_s15, 1 }
  0x13   : > { %1723 = sst [smem:[#allocation8_spill]] %s1740_s16  ;;  %p1560_p4 = por %p342_p2, %p341_p1 }
  0x14   : > { %s326_s19 = ssub.s32 %s1440_s29, %s1740_s16  ;;  %p1217_p6 = scmp.ge.s32.totalorder %s1444_s30, 1 }
  0x15   : > { %p329_p7 = scmp.eq.s32.totalorder %s326_s19, 0  ;;  %p1567_p8 = por %p348_p5, %p347_p3 }
  0x16   : > { %p448_p9 = scmp.lt.s32.totalorder %s1444_s30, 3 }
  0x17   : > { %s1573_s21 = scalar_select %p329_p7, %s1432_s27, %s331_s17  }
  0x18   : > { %p449_p10 = pnand %p1217_p6, %p448_p9 }
  0x19   : > { %s1726_s3 = sld [smem:[#allocation11_spill]] (!%p449_p10)  ;;  %p521_p11 = scmp.lt.s32.totalorder (!%p449_p10), %s1436_s28, 1 }
  0x1a   : > { %452 = sbr.rel (%p449_p10) target bundleno = 1008 (0x3f0), region = 64  ;;  %s1727_s0 = sld [smem:[#allocation9_spill]] (!%p449_p10) }
  0x1b   : > { %s1728_s5 = sld [smem:[#allocation13_spill]] (!%p449_p10)  ;;  %s1622_s16 = sand.u32 (!%p449_p10), 1, %s1428_s26  }
  0x1c   : > { %s1729_s4 = sld [smem:[#allocation12_spill]] (!%p449_p10)  ;;  %s1218_s19 = sshll.u32 (!%p449_p10), %s1622_s16, 3 }
  0x1d   : > { %s1730_s7 = sld [smem:[#allocation15_spill]] (!%p449_p10)  ;;  %s513_s22 = scalar_lea.vmem (!%p449_p10), [#allocation2], %s1218_s19 }
  0x1e   : > { %s1731_s1 = sld [smem:[#allocation10_spill]] (!%p449_p10)  ;;  %s1029_s24 = sshll.u32 (!%p449_p10), %s513_s22, 4  ;;  %s1030_s24 = int_to_ptr.vmem [resolvable:$true] %s1029_s24 }
  0x1f   : > { %v588_v0 = vld [vmem:[%s1726_s3 + $0x8] sm:$0xff]  ;;  %v1446_v1 = vmov 0.0   ;;  %v587_v2 = vld [vmem:[%s1726_s3] sm:$0xff]  ;;  %vm1447_vm0 = vmmov 0   ;;  %s1584_s15 = scalar_select %p521_p11, %s1436_s28, 1  ;;  %vm598_vm1 = vcmask 130048  }
  0x20   : > { %1250 = vmatprep.subr.mxu0 %v1446_v1  ;;  %1254 = vmatprep.mubr.msk.f32.mxu0 %vm1447_vm0, %v1446_v1  ;;  %vm583_vm2 = vcmask 64512   ;;  %s1732_s6 = sld [smem:[#allocation14_spill]]  ;;  %v793_v21 = vld [vmem:[%s1710_s9] sm:$0xf]  ;;  %vm889_vm3 = vcmask 1043456   ;;  %vm885_vm4 = vcmask 31744  }
  0x21   : > { %1251 = vmatpush3.msra.mxu0 %v588_v0  ;;  %1257 = vmatprep.subr.mxu1 %v1446_v1  ;;  %s1588_s17 = sshll.u32 %s1584_s15, 3  ;;  %v590_v4 = vld [vmem:[%s1728_s5] sm:$0xff] }
  0x22   : > { %1252 = vmatprep.subr.mxu0 %v1446_v1  ;;  %1259 = vmatprep.mubr.msk.f32.mxu1 %vm1447_vm0, %v1446_v1  ;;  %s527_s23 = scalar_lea.vmem %s1727_s0, %s1588_s17  ;;  %v1225_v5 = vld [vmem:[%s1729_s4] ss:$0 sm:$0xff]  ;;  %s1240_s0 = sshll.u32 %s1584_s15, 4 }
  0x23   : > { %1253 = vmatpush3.msra.mxu0 %v587_v2  ;;  %v550_v3 = vld [vmem:[%s527_s23] sm:$0xff]  ;;  %1258 = vmatpush3.msra.mxu1 %v590_v4  ;;  %s549_s14 = scalar_lea.vmem %s1712_s11, %s1240_s0  ;;  %s1236_s0 = sshll.u32 %s1436_s28, 7 }
  0x24   : > { %1267 = vmatprep.subr.mxu0 %v1446_v1  ;;  %1255 = vmatmul.mubr.msk.f32.vlgmr.msra.gmra.mxu0 %vm598_vm1, %v550_v3  ;;  %v791_v14 = vld [vmem:[%s1730_s7] sm:$0xff]  ;;  %s534_s23 = scalar_lea.vmem %s1731_s1, %s1588_s17  ;;  %s541_s1 = scalar_lea.vmem %s1703_s2, %s1588_s17 }
  0x25   : > { %551 = vxpose.xlu0.b32.start.end [1/1] (short) (narrow) %v550_v3, 16  ;;  %1269 = vmatprep.mubr.msk.f32.mxu0 %vm1447_vm0, %v1446_v1  ;;  %v586_v17 = vld [vmem:[%s534_s23] sm:$0xff]  ;;  %s1027_s19 = scalar_lea.hbm %s1713_s12, %s1236_s0  ;;  %s1338_s7 = scalar_lea.vmem %s1030_s24, 128 }
  0x26   : > { %1262 = vmatprep.subr.mxu1 %v1446_v1  ;;  %v1227_v15 = vld [vmem:[%s1732_s6] ss:$0 sm:$0xff]  ;;  %1268 = vmatpush3.msk.msra.mxu0 %vm889_vm3, %v793_v21  ;;  %s1007_s6 = scalar_lea.sflag [#allocation3], %s1622_s16  ;;  %p1339_p12 = scmp.ne.s32.totalorder %s1030_s24, %s1338_s7 }
  0x27   : > { %v1229_v22 = vld [vmem:[%s1709_s8] ss:$0 sm:$0xff]  ;;  %s1448_s4 = smov [#allocation2]  }
  0x28   : > { %v1231_v34 = vld [vmem:[%s1711_s10] ss:$0 sm:$0xff]  ;;  %p1340_p13 = pnand %p1339_p12, %p1560_p4  ;;  %s1342_s17 = sshll.u32 %s1448_s4, 4  ;;  %s1343_s17 = int_to_ptr.vmem [resolvable:$false] %s1342_s17 }
  0x29   : > { %v790_v36 = vld [vmem:[%s541_s1] sm:$0xff]  ;;  %s1344_s1 = scalar_lea.vmem %s1343_s17, 256  ;;  %p1345_p1 = scmp.lt.s32.totalorder %s1030_s24, %s1343_s17 }
  0x2a   : > { %p1341_p0 = pneg %p1340_p13  ;;  %p1346_p2 = scmp.lt.s32.totalorder %s1344_s1, %s1338_s7 }
  0x2c   : > { %p1347_p3 = por %p1346_p2, %p1345_p1 }
  0x2e   : > { %p1348_p5 = pnand %p1347_p3, %p1341_p0 }
  0xa1   : > { %v567_v31 = vpop.trf.xlu0 }
  0xa2   : > { %584 = vst.msk [vmem:[%s549_s14] sm:$0xff] %vm583_vm2, %v567_v31 }
  0xa5   : > { %v568_v32 = vpop.trf.xlu0 }
  0xa6   : > { %585 = vst.msk [vmem:[%s549_s14 + $0x8] sm:$0xff] %vm583_vm2, %v568_v32 }
  0xe4   : > { %v668_v6 = vpop.f32.mrf.mxu0 }
  0xe5   : > { %v669_v7 = vadd.f32 %v1225_v5, %v668_v6 }
  0xe6   : > { %v1256_v8 = vpop.f32.mrf.mxu0 }
  0xe7   : > { %v673_v9 = vmul.f32 0.70710677, %v669_v7  ;;  %v672_v11 = vmul.f32 0.5, %v669_v7 }
  0xe9   : > { %1334 = verf.f32 %v673_v9 }
  0xf6   : > { %v1335_v10 = vpop.eup %1334 }
  0xf7   : > { %v675_v12 = vadd.f32 1.0, %v1335_v10 }
  0xf9   : > { %v676_v13 = vmul.f32 %v675_v12, %v672_v11 }
  0xfb   : > { %1260 = vmatmul.mubr.msk.f32.vlgmr.msra.gmra.mxu1 %vm583_vm2, %v676_v13 }
  0xfc   : > { %1264 = vmatprep.mubr.msk.f32.mxu1 %vm1447_vm0, %v1446_v1  ;;  %1263 = vmatpush3.msra.mxu1 %v791_v14 }
 0x1bb   : > { %v752_v16 = vpop.f32.mrf.mxu1 }
 0x1bc   : > { %v753_v18 = vadd.f32 %v1227_v15, %v752_v16 }
 0x1bd   : > { %v1261_v19 = vpop.f32.mrf.mxu1 }
 0x1be   : > { %v756_v20 = vadd.f32 %v753_v18, %v586_v17 }
 0x1c0   : > { %757 = vxpose.xlu0.b32.start.end [1/1] (short) (narrow) %v756_v20, 8  ;;  %1265 = vmatmul.mubr.msk.f32.vlgmr.msra.gmra.mxu1 %vm583_vm2, %v756_v20 }
 0x23c   : > { %v773_v33 = vpop.trf.xlu0 }
 0x23d   : > { %789 = vst.msk [vmem:[%s513_s22] sm:$0xff] %vm583_vm2, %v773_v33 }
 0x280   : > { %v870_v23 = vpop.f32.mrf.mxu1 }
 0x281   : > { %v871_v24 = vadd.f32 %v1229_v22, %v870_v23 }
 0x282   : > { %v1266_v25 = vpop.f32.mrf.mxu1 }
 0x283   : > { %v875_v26 = vmul.f32 0.70710677, %v871_v24  ;;  %v874_v28 = vmul.f32 0.5, %v871_v24 }
 0x285   : > { %1336 = verf.f32 %v875_v26 }
 0x292   : > { %v1337_v27 = vpop.eup %1336 }
 0x293   : > { %v877_v29 = vadd.f32 1.0, %v1337_v27 }
 0x295   : > { %v878_v30 = vmul.f32 %v877_v29, %v874_v28 }
 0x297   : > { %1270 = vmatmul.mubr.msk.f32.vlgmr.msra.gmra.mxu0 %vm885_vm4, %v878_v30 }
 0x357   : > { %v959_v35 = vpop.f32.mrf.mxu0 }
 0x358   : > { %v960_v37 = vadd.f32 %v1231_v34, %v959_v35 }
 0x359   : > { %v1271_v38 = vpop.f32.mrf.mxu0 }
 0x35a   : > { %v963_v39 = vadd.f32 %v960_v37, %v790_v36 }
 0x35b   : > { %1351 = shalt.err (!%p1348_p5)
}
 0x35c   : > { %s1352_s22 = scalar_lea.hbm %s1027_s19, 128  ;;  %s1356_s3 = scalar_lea.hbm %s1713_s12, 256 }
 0x35d   : > { %p1353_p6 = scmp.ne.s32.totalorder %s1027_s19, %s1352_s22  ;;  %p1357_p10 = scmp.lt.s32.totalorder %s1027_s19, %s1713_s12 }
 0x35e   : > { %p1358_p11 = scmp.lt.s32.totalorder %s1356_s3, %s1352_s22 }
 0x35f   : > { %p1354_p7 = pnand %p1353_p6, %p1560_p4 }
 0x360   : > { %p1359_p12 = por %p1358_p11, %p1357_p10 }
 0x361   : > { %p1355_p9 = pneg %p1354_p7 }
 0x363   : > { %p1360_p13 = pnand %p1359_p12, %p1355_p9 }
 0x365   : > { %1363 = shalt.err (!%p1360_p13)
}
 0x366   : > { %1272 = dma.vmem_to_hbm [thread:$0]  (%p1560_p4), %s1030_s24, 128, %s1027_s19, %s1007_s6   ;;  %964 = vxpose.xlu1.b32.start.end [1/1] (short) (narrow) %v963_v39, 8  ;;  %vm996_vm5 = vcmask 60416  }
 0x367   : > { %s1219_s7 = sshll.u32 %s1622_s16, 2  ;;  %s1237_s14 = sshll.u32 %s1436_s28, 6 }
 0x368   : > { %s520_s4 = scalar_lea.vmem [#allocation4], %s1219_s7  ;;  %s1660_s22 = scalar_lea.hbm %s1714_s13, %s1237_s14 }
 0x369   : > { %s1043_s17 = sshll.u32 %s520_s4, 4  ;;  %s1012_s15 = scalar_lea.sflag [#allocation5], %s1622_s16  ;;  %s1044_s17 = int_to_ptr.vmem [resolvable:$true] %s1043_s17 }
 0x36a   : > { %s1364_s3 = scalar_lea.vmem %s1044_s17, 64  ;;  %s1449_s6 = smov [#allocation4]  }
 0x36b   : > { %p1365_p0 = scmp.ne.s32.totalorder %s1044_s17, %s1364_s3  ;;  %s1368_s24 = sshll.u32 %s1449_s6, 4  ;;  %s1369_s24 = int_to_ptr.vmem [resolvable:$false] %s1368_s24 }
 0x36c   : > { %s1370_s28 = scalar_lea.vmem %s1369_s24, 128  ;;  %p1371_p3 = scmp.lt.s32.totalorder %s1044_s17, %s1369_s24 }
 0x36d   : > { %p1366_p1 = pnand %p1365_p0, %p1560_p4  ;;  %p1372_p5 = scmp.lt.s32.totalorder %s1370_s28, %s1364_s3 }
 0x36f   : > { %p1367_p2 = pneg %p1366_p1  ;;  %p1373_p6 = por %p1372_p5, %p1371_p3 }
 0x371   : > { %p1374_p7 = pnand %p1373_p6, %p1367_p2 }
 0x3e2   : > { %v980_v40 = vpop.trf.xlu1 }
 0x3e3   : > { %997 = vst.msk [vmem:[%s520_s4] sm:$0xf] %vm996_vm5, %v980_v40 }
 0x3e4   : > { %1377 = shalt.err (!%p1374_p7)
}
 0x3e5   : > { %s1378_s19 = scalar_lea.hbm %s1660_s22, 64  ;;  %s1382_s0 = scalar_lea.hbm %s1714_s13, 128 }
 0x3e6   : > { %p1379_p9 = scmp.ne.s32.totalorder %s1660_s22, %s1378_s19  ;;  %p1383_p12 = scmp.lt.s32.totalorder %s1660_s22, %s1714_s13 }
 0x3e7   : > { %p1384_p13 = scmp.lt.s32.totalorder %s1382_s0, %s1378_s19 }
 0x3e8   : > { %p1380_p10 = pnand %p1379_p9, %p1560_p4 }
 0x3e9   : > { %p1385_p0 = por %p1384_p13, %p1383_p12 }
 0x3ea   : > { %p1381_p11 = pneg %p1380_p10 }
 0x3ec   : > { %p1386_p1 = pnand %p1385_p0, %p1381_p11 }
 0x3ee   : > { %1389 = shalt.err (!%p1386_p1)
}
 0x3ef   : > { %1273 = dma.vmem_to_hbm [thread:$0]  (%p1560_p4), %s1044_s17, 64, %s1660_s22, %s1012_s15  }
 0x3f0 PF: > { %p1283_p2 = scmp.ge.s32.totalorder %s1444_s30, 2  ;;  %s1066_s4 = sand.u32 1, %s1424_s25  }
 0x3f1   : > { %s1067_s1 = scalar_lea.sflag [#allocation3], %s1066_s4 }
 0x3f2   : > { %p1277_p3 = pnand %p1283_p2, %p1567_p8 }
 0x3f4   : > { %p1278_p5 = pneg %p1277_p3 }
 0x3f6   : > { %1415 = dma.done.wait (%p1278_p5), %s1067_s1, 128  }
 0x3f7   : > { %1417 = vsyncadd (%p1278_p5), %s1067_s1, 4294967168  ;;  %s1076_s5 = scalar_lea.sflag [#allocation5], %s1066_s4 }
 0x3f8   : > { %1419 = dma.done.wait (%p1278_p5), %s1076_s5, 64  }
 0x3f9   : > { %1421 = vsyncadd (%p1278_p5), %s1076_s5, 4294967232  ;;  %s30_s30 = sadd.s32 1, %s1444_s30   ;;  %s1733_s18 = sld [smem:[#allocation8_spill]] }
 0x3fa   : > { %p27_p6 = scmp.ge.s32.totalorder %s30_s30, 4   ;;  %s1734_s25 = smov %s1428_s26 }
 0x3fb   : > { %s1735_s26 = smov %s1432_s27  ;;  %s1736_s27 = smov %s1573_s21 }
 0x3fc   : > { %s1737_s28 = smov %s1440_s29  ;;  %29 = sbr.rel (!%p27_p6) target bundleno = 14 (0xe), region = 134 }
 0x3ff   : > { %s1738_s29 = smov %s1733_s18 }
 0x401   :  { %1081 = vsyncpa [#allocation3], 1 }
 0x402   :  { %1083 = vsyncpa [#allocation3 + $0x1], 1 }
 0x403   :  { %1084 = vsyncpa [#allocation5], 1 }
 0x404   :  { %1086 = vsyncpa [#allocation5 + $0x1], 1 }

</bundles_post_ra>
